<compile_context>
chip_gen: v5e
topology: v5e:2x2
jax: 0.10.0
libtpu: 0.0.40
codegen_flags: <defaults>
</compile_context>

<pallas_src>
from typing import NamedTuple

import jax
import jax.numpy as jnp
from jax.experimental import pallas as pl
from jax.experimental.pallas import tpu as pltpu


def _round_up(x, m):
    return (x + m - 1) // m * m


class MLPParams(NamedTuple):
    w1: jax.Array   # (n_in_p, hid_p)   compute dtype
    b1: jax.Array   # (1, hid_p)        f32
    w2: jax.Array   # (hid_p, n_out_p)  compute dtype
    b2: jax.Array   # (1, n_out_p)      f32
    n_in: int
    hidden: int
    n_out: int


def prepare_mlp_params(w1_t, b1, w2_t, b2, *, compute_dtype=jnp.bfloat16, lane=128):
    """Pad params once (multiples of 128, zero padding is inert through
    matmul + ReLU) and cast weights to the MXU compute dtype. Biases stay f32."""
    n_in, hidden = w1_t.shape
    n_out = w2_t.shape[1]
    n_in_p = _round_up(n_in, lane)
    hid_p = _round_up(hidden, lane)
    n_out_p = _round_up(n_out, lane)

    w1_p = jnp.zeros((n_in_p, hid_p), compute_dtype).at[:n_in, :hidden].set(
        w1_t.astype(compute_dtype))
    b1_p = jnp.zeros((1, hid_p), jnp.float32).at[0, :hidden].set(
        b1.astype(jnp.float32))
    w2_p = jnp.zeros((hid_p, n_out_p), compute_dtype).at[:hidden, :n_out].set(
        w2_t.astype(compute_dtype))
    b2_p = jnp.zeros((1, n_out_p), jnp.float32).at[0, :n_out].set(
        b2.astype(jnp.float32))
    return MLPParams(w1_p, b1_p, w2_p, b2_p, n_in, hidden, n_out)


def _vmem_budget_bytes():
    """Generation-aware soft VMEM ceiling (leave headroom under physical)."""
    phys = 64 << 20  # conservative default if query fails (v7x-class)
    try:
        info = pltpu.get_tpu_info()
        phys = int(getattr(info, "vmem_capacity_bytes", phys))
    except Exception:
        pass
    if phys <= (64 << 20) + (1 << 20):
        return 48 << 20          # v7x: 64 MiB physical per TC
    return 100 << 20             # v5e / v6e: 128 MiB physical


def _choose_hidden_chunk(hid_p, tb, n_in_p, n_out_p, isz, osz, budget):
    """Pick the widest hidden chunk (multiple of 128, dividing hid_p) whose
    VMEM footprint fits the budget. nk==1 => weights fully resident,
    single-buffered; nk>1 => chunked weights, double-buffered."""
    fixed = (2 * tb * n_in_p * isz        # x tile, double-buffered
             + 2 * tb * n_out_p * osz     # y tile, double-buffered
             + tb * n_out_p * 4           # f32 accumulator scratch
             + n_out_p * 4)               # b2, single-buffered
    units = hid_p // 128
    choice = None
    for nk in range(1, units + 1):
        if units % nk:
            continue
        th = hid_p // nk
        nbuf = 1 if nk == 1 else 2
        need = (fixed
                + nbuf * (n_in_p * th * isz + th * 4 + th * n_out_p * isz)
                + tb * th * 4)            # (tb, th) hidden intermediate (f32)
        choice = (th, nk, need)           # keeps shrinking as nk grows
        if need <= budget:
            return choice
    return choice                         # smallest chunk; let Mosaic try


def mlp_kernel(x_ref, w1_ref, b1_ref, w2_ref, b2_ref, y_ref, acc_ref):
    k = pl.program_id(1)

    @pl.when(k == 0)
    def _init():
        acc_ref[...] = jnp.zeros_like(acc_ref)

    # fc1 chunk: h = relu(x @ W1[:, chunk] + b1[chunk])   (f32 accumulation)
    h = jnp.dot(x_ref[...], w1_ref[...], preferred_element_type=jnp.float32)
    h = jnp.maximum(h + b1_ref[...], 0.0)
    # out chunk: acc += h @ W2[chunk, :]
    acc_ref[...] += jnp.dot(h.astype(w2_ref.dtype), w2_ref[...],
                            preferred_element_type=jnp.float32)

    @pl.when(k == pl.num_programs(1) - 1)
    def _finalize():
        y_ref[...] = (acc_ref[...] + b2_ref[...]).astype(y_ref.dtype)


def mlp_forward(x, params: MLPParams, *, tb=None):
    """x: [B, n_in] (any float dtype). Returns [B, n_out] in x.dtype."""
    B, n_in = x.shape
    assert n_in == params.n_in, "input feature mismatch"
    n_in_p, hid_p = params.w1.shape
    n_out_p = params.w2.shape[1]
    cdt = params.w1.dtype
    out_dtype = x.dtype

    # Adaptive batch tile: small batches -> 8-row tile, big batches -> 512.
    if tb is None:
        tb = min(512, _round_up(B, 8))
    else:
        tb = _round_up(max(int(tb), 8), 8)
    b_p = _round_up(B, tb)
    nb = b_p // tb

    budget = _vmem_budget_bytes()
    isz = jnp.dtype(cdt).itemsize
    osz = jnp.dtype(out_dtype).itemsize
    th, nk, need = _choose_hidden_chunk(hid_p, tb, n_in_p, n_out_p, isz, osz, budget)
    nbuf = 1 if nk == 1 else 2

    # Per-call work: only x is padded / cast.
    x_p = jnp.zeros((b_p, n_in_p), cdt).at[:B, :n_in].set(x.astype(cdt))

    # Advisory cost estimate for XLA's scheduler.
    weight_reads = 1 if nk == 1 else nb
    flops = 2 * b_p * (n_in_p * hid_p + hid_p * n_out_p)
    bytes_accessed = (b_p * n_in_p * isz + b_p * n_out_p * osz
                      + weight_reads * (n_in_p * hid_p + hid_p * n_out_p) * isz
                      + (hid_p + n_out_p) * 4)
    cost = pl.CostEstimate(flops=int(flops), transcendentals=0,
                           bytes_accessed=int(bytes_accessed))

    vmem_limit = int(min(budget, max(16 << 20, int(need * 1.5))))

    in_specs = [
        # x tile: changes only with the batch index -> re-DMA elided across k.
        pl.BlockSpec((tb, n_in_p), lambda i, k: (i, 0)),
        # Weights/biases: single-buffered when fully resident (nk == 1),
        # default double-buffered when chunked over the hidden axis.
        pl.BlockSpec((n_in_p, th), lambda i, k: (0, k),
                     pipeline_mode=pl.Buffered(nbuf)),
        pl.BlockSpec((1, th), lambda i, k: (0, k),
                     pipeline_mode=pl.Buffered(nbuf)),
        pl.BlockSpec((th, n_out_p), lambda i, k: (k, 0),
                     pipeline_mode=pl.Buffered(nbuf)),
        pl.BlockSpec((1, n_out_p), lambda i, k: (0, 0),
                     pipeline_mode=pl.Buffered(1)),
    ]
    out_specs = pl.BlockSpec((tb, n_out_p), lambda i, k: (i, 0))

    y_p = pl.pallas_call(
        mlp_kernel,
        out_shape=jax.ShapeDtypeStruct((b_p, n_out_p), out_dtype),
        grid_spec=pltpu.PrefetchScalarGridSpec(
            num_scalar_prefetch=0,
            grid=(nb, nk),
            in_specs=in_specs,
            out_specs=out_specs,
            scratch_shapes=[pltpu.VMEM((tb, n_out_p), jnp.float32)],
        ),
        compiler_params=pltpu.CompilerParams(
            dimension_semantics=("parallel", "arbitrary"),
            vmem_limit_bytes=vmem_limit,
        ),
        cost_estimate=cost,
    )(x_p, params.w1, params.b1, params.w2, params.b2)

    return y_p[:B, :params.n_out]


def init_mlp_params(key, n_in, hidden, n_out):
    """Match PyTorch MLP.__init__: weights ~ N(0, 0.01), biases ~ default
    nn.Linear init U(-1/sqrt(fan_in), 1/sqrt(fan_in))."""
    k1, k2, k3, k4 = jax.random.split(key, 4)
    w1 = jax.random.normal(k1, (hidden, n_in), jnp.float32) * 0.01   # torch [out, in]
    w2 = jax.random.normal(k2, (n_out, hidden), jnp.float32) * 0.01
    bound1 = 1.0 / jnp.sqrt(jnp.float32(n_in))
    bound2 = 1.0 / jnp.sqrt(jnp.float32(hidden))
    b1 = jax.random.uniform(k3, (hidden,), jnp.float32, -bound1, bound1)
    b2 = jax.random.uniform(k4, (n_out,), jnp.float32, -bound2, bound2)
    # pre-transpose for the kernel: [in, out]
    return w1.T, b1, w2.T, b2


if __name__ == "__main__":
    key = jax.random.PRNGKey(0)
    kx, kp = jax.random.split(key)

    batch, n_in, hidden, n_out = 2, 16, 32, 8
    x = jax.random.normal(kx, (batch, n_in), jnp.float32)
    w1_t, b1, w2_t, b2 = init_mlp_params(kp, n_in, hidden, n_out)

    # pure-JAX reference
    ref = jnp.maximum(x @ w1_t + b1, 0.0) @ w2_t + b2

    # fp32 path: exact (up to f32 rounding) vs. reference.
    params_f32 = prepare_mlp_params(w1_t, b1, w2_t, b2, compute_dtype=jnp.float32)
    y_f32 = jax.block_until_ready(mlp_forward(x, params_f32))
    assert y_f32.shape == (batch, n_out)
    assert jnp.allclose(y_f32, ref, atol=1e-5, rtol=1e-5), "fp32 mismatch vs reference"

    # bf16 MXU-input path (default for performance): loose tolerance.
    params_bf16 = prepare_mlp_params(w1_t, b1, w2_t, b2, compute_dtype=jnp.bfloat16)
    y_bf16 = jax.block_until_ready(mlp_forward(x, params_bf16))
    assert y_bf16.shape == (batch, n_out)
    assert jnp.allclose(y_bf16, ref, atol=5e-2, rtol=5e-2), "bf16 mismatch vs reference"

    print("KERNEL_OK")
</pallas_src>

<mosaic_0001>
module attributes {stable_mosaic.version = 11 : i64} {
  func.func @mlp_kernel(%arg0: i32, %arg1: i32, %arg2: memref<8x128xf32, #tpu.memory_space<vmem>>, %arg3: memref<128x128xf32, #tpu.memory_space<vmem>>, %arg4: memref<1x128xf32, #tpu.memory_space<vmem>>, %arg5: memref<128x128xf32, #tpu.memory_space<vmem>>, %arg6: memref<1x128xf32, #tpu.memory_space<vmem>>, %arg7: memref<8x128xf32, #tpu.memory_space<vmem>>, %arg8: memref<8x128xf32, #tpu.memory_space<vmem>>) attributes {dimension_semantics = [#tpu.dimension_semantics<parallel>, #tpu.dimension_semantics<arbitrary>], iteration_bounds = array<i64: 1, 1>, scalar_prefetch = 0 : i64, scratch_operands = 1 : i64, tpu.core_type = #tpu.core_type<tc>, window_params = [{transform_indices = @transform_0, window_bounds = array<i64: 8, 128>}, {pipeline_mode = #tpu.pipeline_mode<synchronous>, transform_indices = @transform_1, window_bounds = array<i64: 128, 128>}, {pipeline_mode = #tpu.pipeline_mode<synchronous>, transform_indices = @transform_2, window_bounds = array<i64: 1, 128>}, {pipeline_mode = #tpu.pipeline_mode<synchronous>, transform_indices = @transform_3, window_bounds = array<i64: 128, 128>}, {pipeline_mode = #tpu.pipeline_mode<synchronous>, transform_indices = @transform_4, window_bounds = array<i64: 1, 128>}, {transform_indices = @transform_5, window_bounds = array<i64: 8, 128>}]} {
    %c0_i32 = arith.constant 0 : i32
    %0 = arith.cmpi eq, %arg1, %c0_i32 : i32
    %1 = arith.extui %0 : i1 to i32
    %c0_i32_0 = arith.constant 0 : i32
    %2 = arith.cmpi ne, %1, %c0_i32_0 : i32
    scf.if %2 {
      %cst_16 = arith.constant 0.000000e+00 : f32
      %19 = vector.broadcast %cst_16 : f32 to vector<8x128xf32>
      %c0_17 = arith.constant 0 : index
      %c0_18 = arith.constant 0 : index
      %20 = vector.load %arg8[%c0_17, %c0_18] : memref<8x128xf32, #tpu.memory_space<vmem>>, vector<8x128xf32>
      tpu.vector_store %arg8[%c0_17, %c0_18], %19 {strides = array<i32>} : memref<8x128xf32, #tpu.memory_space<vmem>>, vector<8x128xf32>,
    } else {
    }
    %c0 = arith.constant 0 : index
    %c0_1 = arith.constant 0 : index
    %3 = vector.load %arg2[%c0, %c0_1] : memref<8x128xf32, #tpu.memory_space<vmem>>, vector<8x128xf32>
    %c0_2 = arith.constant 0 : index
    %c0_3 = arith.constant 0 : index
    %4 = vector.load %arg3[%c0_2, %c0_3] : memref<128x128xf32, #tpu.memory_space<vmem>>, vector<128x128xf32>
    %cst = arith.constant dense<0.000000e+00> : vector<8x128xf32>
    %5 = tpu.matmul %3, %4, %cst {dimension_numbers = #tpu.dot_dimension_numbers<[1], [0], [0], [1], [0, 0, 1, 1], [], []>} : vector<8x128xf32>, vector<128x128xf32>, vector<8x128xf32> -> vector<8x128xf32>
    %c0_4 = arith.constant 0 : index
    %c0_5 = arith.constant 0 : index
    %6 = vector.load %arg4[%c0_4, %c0_5] : memref<1x128xf32, #tpu.memory_space<vmem>>, vector<1x128xf32>
    %7 = vector.broadcast %6 : vector<1x128xf32> to vector<8x128xf32>
    %8 = arith.addf %5, %7 : vector<8x128xf32>
    %cst_6 = arith.constant 0.000000e+00 : f32
    %9 = vector.broadcast %cst_6 : f32 to vector<8x128xf32>
    %10 = arith.maximumf %8, %9 : vector<8x128xf32>
    %c0_7 = arith.constant 0 : index
    %c0_8 = arith.constant 0 : index
    %11 = vector.load %arg8[%c0_7, %c0_8] : memref<8x128xf32, #tpu.memory_space<vmem>>, vector<8x128xf32>
    %c0_9 = arith.constant 0 : index
    %c0_10 = arith.constant 0 : index
    %12 = vector.load %arg5[%c0_9, %c0_10] : memref<128x128xf32, #tpu.memory_space<vmem>>, vector<128x128xf32>
    %cst_11 = arith.constant dense<0.000000e+00> : vector<8x128xf32>
    %13 = tpu.matmul %10, %12, %cst_11 {dimension_numbers = #tpu.dot_dimension_numbers<[1], [0], [0], [1], [0, 0, 1, 1], [], []>} : vector<8x128xf32>, vector<128x128xf32>, vector<8x128xf32> -> vector<8x128xf32>
    %14 = arith.addf %11, %13 : vector<8x128xf32>
    %c0_12 = arith.constant 0 : index
    %c0_13 = arith.constant 0 : index
    %15 = vector.load %arg8[%c0_12, %c0_13] : memref<8x128xf32, #tpu.memory_space<vmem>>, vector<8x128xf32>
    tpu.vector_store %arg8[%c0_12, %c0_13], %14 {strides = array<i32>} : memref<8x128xf32, #tpu.memory_space<vmem>>, vector<8x128xf32>,
    %c0_i32_14 = arith.constant 0 : i32
    %16 = arith.cmpi eq, %arg1, %c0_i32_14 : i32
    %17 = arith.extui %16 : i1 to i32
    %c0_i32_15 = arith.constant 0 : i32
    %18 = arith.cmpi ne, %17, %c0_i32_15 : i32
    scf.if %18 {
      %c0_16 = arith.constant 0 : index
      %c0_17 = arith.constant 0 : index
      %19 = vector.load %arg8[%c0_16, %c0_17] : memref<8x128xf32, #tpu.memory_space<vmem>>, vector<8x128xf32>
      %c0_18 = arith.constant 0 : index
      %c0_19 = arith.constant 0 : index
      %20 = vector.load %arg6[%c0_18, %c0_19] : memref<1x128xf32, #tpu.memory_space<vmem>>, vector<1x128xf32>
      %21 = vector.broadcast %20 : vector<1x128xf32> to vector<8x128xf32>
      %22 = arith.addf %19, %21 : vector<8x128xf32>
      %c0_20 = arith.constant 0 : index
      %c0_21 = arith.constant 0 : index
      %23 = vector.load %arg7[%c0_20, %c0_21] : memref<8x128xf32, #tpu.memory_space<vmem>>, vector<8x128xf32>
      tpu.vector_store %arg7[%c0_20, %c0_21], %22 {strides = array<i32>} : memref<8x128xf32, #tpu.memory_space<vmem>>, vector<8x128xf32>,
    } else {
    }
    return
  }
  func.func @transform_0(%arg0: i32, %arg1: i32) -> (i32, i32) {
    %c0_i32 = arith.constant 0 : i32
    %c0_i32_0 = arith.constant 0 : i32
    return %arg0, %c0_i32 : i32, i32
  }
  func.func @transform_1(%arg0: i32, %arg1: i32) -> (i32, i32) {
    %c0_i32 = arith.constant 0 : i32
    %c0_i32_0 = arith.constant 0 : i32
    return %c0_i32, %arg1 : i32, i32
  }
  func.func @transform_2(%arg0: i32, %arg1: i32) -> (i32, i32) {
    %c0_i32 = arith.constant 0 : i32
    %c0_i32_0 = arith.constant 0 : i32
    return %c0_i32, %arg1 : i32, i32
  }
  func.func @transform_3(%arg0: i32, %arg1: i32) -> (i32, i32) {
    %c0_i32 = arith.constant 0 : i32
    %c0_i32_0 = arith.constant 0 : i32
    return %arg1, %c0_i32 : i32, i32
  }
  func.func @transform_4(%arg0: i32, %arg1: i32) -> (i32, i32) {
    %c0_i32 = arith.constant 0 : i32
    %c0_i32_0 = arith.constant 0 : i32
    %c0_i32_1 = arith.constant 0 : i32
    return %c0_i32, %c0_i32_0 : i32, i32
  }
  func.func @transform_5(%arg0: i32, %arg1: i32) -> (i32, i32) {
    %c0_i32 = arith.constant 0 : i32
    %c0_i32_0 = arith.constant 0 : i32
    return %arg0, %c0_i32 : i32, i32
  }
}

</mosaic_0001>

<bundles_post_ra>
// kernel: tpu_custom_call.1
= control target key start
LH: loop header
LB: loop body
LE: loop exit
PB: predicated region body
PF: predicated region fallthrough
CT: control target
= control target key end

     0   :  { %10 = vsyncpa [#allocation4], 0  ;;  %s344_s0 = inlined_call_operand.hbm [shape: f32[8,128], index: 0, kind: input, shape index: {}]   ;;  %s345_s1 = inlined_call_operand.hbm [shape: f32[128,128], index: 1, kind: input, shape index: {}]   ;;  %s346_s2 = inlined_call_operand.vmem [shape: f32[1,128], index: 2, kind: input, shape index: {}]   ;;  %s347_s3 = inlined_call_operand.hbm [shape: f32[128,128], index: 3, kind: input, shape index: {}]   ;;  %s348_s4 = inlined_call_operand.vmem [shape: f32[1,128], index: 4, kind: input, shape index: {}]   ;;  %s349_s5 = inlined_call_operand.hbm [shape: f32[8,128], index: 5, kind: output, shape index: {}]  }
   0x1   :  { %11 = vsyncpa [#allocation7], 0  ;;  %s28_s20 = sshll.u32 %s345_s1, 4  ;;  %s29_s20 = int_to_ptr.hbm [resolvable:$true] %s28_s20 }
   0x2   :  { %12 = vsyncpa [#allocation5], 0  ;;  %s290_s21 = smov [#allocation6]   ;;  %s18_s25 = sshll.u32 %s344_s0, 4  ;;  %s19_s25 = int_to_ptr.hbm [resolvable:$true] %s18_s25 }
   0x3   :  { %s30_s22 = sshll.u32 %s290_s21, 4  ;;  %s291_s26 = smov 128   ;;  %s31_s22 = int_to_ptr.vmem [resolvable:$true] %s30_s22 }
   0x4   :  { %s292_s27 = smov 8   ;;  %s293_s28 = smov [#allocation3]  }
   0x5   :  { %36 = dma.hbm_to_vmem [thread:$0]  %s29_s20, 2048, %s31_s22, [#allocation7], %s291_s26, %s291_s26, %s292_s27  }
   0x6   :  { %s20_s29 = sshll.u32 %s293_s28, 4  ;;  %s43_s7 = sshll.u32 %s347_s3, 4  ;;  %s21_s29 = int_to_ptr.vmem [resolvable:$true] %s20_s29  ;;  %s44_s7 = int_to_ptr.hbm [resolvable:$true] %s43_s7 }
   0x7   :  { %23 = dma.hbm_to_vmem [thread:$0]  %s19_s25, 128, %s21_s29, [#allocation4]  }
   0x8   :  { %s294_s1 = smov [#allocation8]  }
   0x9   :  { %s45_s8 = sshll.u32 %s294_s1, 4  ;;  %s46_s8 = int_to_ptr.vmem [resolvable:$true] %s45_s8 }
   0xa   :  { %51 = dma.hbm_to_vmem [thread:$0]  %s44_s7, 2048, %s46_s8, [#allocation7], %s291_s26, %s291_s26, %s292_s27  }
   0xb   :  { %284 = dma.done.wait [#allocation4], 128  }
   0xc   :  { %285 = vsyncadd [#allocation4], 4294967168 }
   0xd   :  { %286 = dma.done.wait [#allocation7], 4096  }
   0xe   :  { %287 = vsyncadd [#allocation7], 4294963200  ;;  %v87_v0 = vld [vmem:[#allocation6 + $0x78] sm:$0xff]  ;;  %v86_v1 = vld [vmem:[#allocation6 + $0x70] sm:$0xff]  ;;  %s295_s11 = smov [#allocation9]   ;;  %s169_s15 = sshll.u32 %s349_s5, 4  ;;  %s170_s15 = int_to_ptr.hbm [resolvable:$true] %s169_s15 }
   0xf   :  { %92 = vmatpush.msra.mxu0 %v87_v0  ;;  %v85_v2 = vld [vmem:[#allocation6 + $0x68] sm:$0xff]  ;;  %v84_v3 = vld [vmem:[#allocation6 + $0x60] sm:$0xff]  ;;  %v129_v4 = vld [vmem:[#allocation8 + $0x78] sm:$0xff]  ;;  %s167_s12 = sshll.u32 %s295_s11, 4  ;;  %s168_s12 = int_to_ptr.vmem [resolvable:$true] %s167_s12 }
  0x10   :  { %v83_v5 = vld [vmem:[#allocation6 + $0x58] sm:$0xff]  ;;  %130 = vmatpush.msra.mxu1 %v129_v4  ;;  %v128_v6 = vld [vmem:[#allocation8 + $0x70] sm:$0xff]  ;;  %v127_v7 = vld [vmem:[#allocation8 + $0x68] sm:$0xff] }
  0x11   :  { %93 = vmatpush.msra.mxu0 %v86_v1  ;;  %v82_v8 = vld [vmem:[#allocation6 + $0x50] sm:$0xff]  ;;  %v126_v9 = vld [vmem:[#allocation8 + $0x60] sm:$0xff]  ;;  %v81_v10 = vld [vmem:[#allocation6 + $0x48] sm:$0xff] }
  0x12   :  { %131 = vmatpush.msra.mxu1 %v128_v6  ;;  %v125_v11 = vld [vmem:[#allocation8 + $0x58] sm:$0xff]  ;;  %v80_v12 = vld [vmem:[#allocation6 + $0x40] sm:$0xff]  ;;  %v124_v13 = vld [vmem:[#allocation8 + $0x50] sm:$0xff] }
  0x13   :  { %94 = vmatpush.msra.mxu0 %v85_v2  ;;  %v79_v14 = vld [vmem:[#allocation6 + $0x38] sm:$0xff]  ;;  %v123_v15 = vld [vmem:[#allocation8 + $0x48] sm:$0xff]  ;;  %v78_v16 = vld [vmem:[#allocation6 + $0x30] sm:$0xff] }
  0x14   :  { %132 = vmatpush.msra.mxu1 %v127_v7  ;;  %v122_v17 = vld [vmem:[#allocation8 + $0x40] sm:$0xff]  ;;  %v77_v18 = vld [vmem:[#allocation6 + $0x28] sm:$0xff]  ;;  %v121_v19 = vld [vmem:[#allocation8 + $0x38] sm:$0xff] }
  0x15   :  { %95 = vmatpush.msra.mxu0 %v84_v3  ;;  %v76_v20 = vld [vmem:[#allocation6 + $0x20] sm:$0xff]  ;;  %v120_v21 = vld [vmem:[#allocation8 + $0x30] sm:$0xff]  ;;  %v75_v22 = vld [vmem:[#allocation6 + $0x18] sm:$0xff] }
  0x16   :  { %133 = vmatpush.msra.mxu1 %v126_v9  ;;  %v119_v23 = vld [vmem:[#allocation8 + $0x28] sm:$0xff]  ;;  %v74_v24 = vld [vmem:[#allocation6 + $0x10] sm:$0xff]  ;;  %v118_v25 = vld [vmem:[#allocation8 + $0x20] sm:$0xff] }
  0x17   :  { %96 = vmatpush.msra.mxu0 %v83_v5  ;;  %v73_v26 = vld [vmem:[#allocation6 + $0x8] sm:$0xff]  ;;  %v117_v27 = vld [vmem:[#allocation8 + $0x18] sm:$0xff]  ;;  %v72_v28 = vld [vmem:[#allocation6] sm:$0xff] }
  0x18   :  { %134 = vmatpush.msra.mxu1 %v125_v11  ;;  %v71_v29 = vld [vmem:[#allocation3] sm:$0xff]  ;;  %v116_v30 = vld [vmem:[#allocation8 + $0x10] sm:$0xff]  ;;  %v115_v31 = vld [vmem:[#allocation8 + $0x8] sm:$0xff] }
  0x19   :  { %97 = vmatpush.msra.mxu0 %v82_v8  ;;  %v114_v32 = vld [vmem:[#allocation8] sm:$0xff]  ;;  %v186_v33 = vld [vmem:[%s346_s2] ss:$0 sm:$0xff] }
  0x1a   :  { %135 = vmatpush.msra.mxu1 %v124_v13  ;;  %v187_v37 = vld [vmem:[%s348_s4] ss:$0 sm:$0xff] }
  0x1b   :  { %98 = vmatpush.msra.mxu0 %v81_v10 }
  0x1c   :  { %136 = vmatpush.msra.mxu1 %v123_v15 }
  0x1d   :  { %99 = vmatpush.msra.mxu0 %v80_v12 }
  0x1e   :  { %137 = vmatpush.msra.mxu1 %v122_v17 }
  0x1f   :  { %100 = vmatpush.msra.mxu0 %v79_v14 }
  0x20   :  { %138 = vmatpush.msra.mxu1 %v121_v19 }
  0x21   :  { %101 = vmatpush.msra.mxu0 %v78_v16 }
  0x22   :  { %139 = vmatpush.msra.mxu1 %v120_v21 }
  0x23   :  { %102 = vmatpush.msra.mxu0 %v77_v18 }
  0x24   :  { %140 = vmatpush.msra.mxu1 %v119_v23 }
  0x25   :  { %103 = vmatpush.msra.mxu0 %v76_v20 }
  0x26   :  { %141 = vmatpush.msra.mxu1 %v118_v25 }
  0x27   :  { %104 = vmatpush.msra.mxu0 %v75_v22 }
  0x28   :  { %142 = vmatpush.msra.mxu1 %v117_v27 }
  0x29   :  { %105 = vmatpush.msra.mxu0 %v74_v24 }
  0x2a   :  { %143 = vmatpush.msra.mxu1 %v116_v30 }
  0x2b   :  { %106 = vmatpush.msra.mxu0 %v73_v26 }
  0x2c   :  { %144 = vmatpush.msra.mxu1 %v115_v31 }
  0x2d   :  { %107 = vmatpush.msra.mxu0 %v72_v28 }
  0x2e   :  { %108 = vmatmul.f32.vlgmr.msra.gmra.mxu0 %v71_v29  ;;  %145 = vmatpush.msra.mxu1 %v114_v32 }
  0xab   :  { %v109_v34 = vpop.f32.mrf.mxu0 }
  0xac   :  { %v110_v35 = vadd.f32 %v186_v33, %v109_v34 }
  0xae   :  { %v112_v36 = vmax.f32 %v110_v35, 0.0 }
  0xb0   :  { %146 = vmatmul.f32.vlgmr.msra.gmra.mxu1 %v112_v36 }
 0x12d   :  { %v147_v38 = vpop.f32.mrf.mxu1 }
 0x12e   :  { %v160_v39 = vadd.f32 %v187_v37, %v147_v38 }
 0x130   :  { %161 = vst [vmem:[#allocation9] sm:$0xff] %v160_v39 }
 0x131   :  { %172 = dma.vmem_to_hbm [thread:$0]  %s168_s12, 128, %s170_s15, [#allocation5]  }
 0x132   :  { %288 = dma.done.wait [#allocation5], 128  }
 0x133   :  { %289 = vsyncadd [#allocation5], 4294967168 }
 0x134   :  { %177 = vsyncpa [#allocation4], 1 }
 0x135   :  { %178 = vsyncpa [#allocation7], 1 }
 0x136   :  { %179 = vsyncpa [#allocation5], 1 }

</bundles_post_ra>
